<compile_context>
chip_gen: v7x
topology: tpu7x:2x2x1
jax: 0.10.0
libtpu: 0.0.40
codegen_flags: <defaults>
</compile_context>

<pallas_src>
import math
import numpy as np
import jax
import jax.numpy as jnp
from jax import lax
from jax.experimental import pallas as pl
from jax.experimental.pallas import tpu as pltpu

BN_EPS = 1e-5
LANE = 128

_VMEM_SPEC = pl.BlockSpec(memory_space=pltpu.MemorySpace.VMEM)


# -----------------------------------------------------------------------------
# pltpu.roll shift-direction probe (run once).  A wrong sign would silently
# flip the 3x3 taps, so we detect the hardware/op convention instead of
# assuming it.
# -----------------------------------------------------------------------------
_ROLL_IS_JNP = None


def _roll_matches_jnp():
    global _ROLL_IS_JNP
    if _ROLL_IS_JNP is None:
        def probe(x_ref, o_ref):
            o_ref[...] = pltpu.roll(x_ref[...], 1, 1)

        x = jnp.arange(LANE, dtype=jnp.float32).reshape(1, LANE)
        r = pl.pallas_call(
            probe,
            out_shape=jax.ShapeDtypeStruct((1, LANE), jnp.float32),
            in_specs=[_VMEM_SPEC],
            out_specs=_VMEM_SPEC,
        )(x)
        first = float(r[0, 0])
        if first == float(LANE - 1):
            _ROLL_IS_JNP = True          # out[p] = x[(p - shift) % n]  (jnp.roll)
        elif first == 1.0:
            _ROLL_IS_JNP = False         # out[p] = x[(p + shift) % n]
        else:
            raise RuntimeError("unexpected pltpu.roll semantics")
    return _ROLL_IS_JNP


# -----------------------------------------------------------------------------
# Pallas kernel: fused ConvBN
#   1x1 conv -> BN(train) -> ReLU -> 3x3 conv (stride 1 or 2) -> BN(train) -> ReLU
# -----------------------------------------------------------------------------
def _build_convbn_kernel(Ci, n_valid, cnt2, shifts, compute_dtype):
    inv1 = 1.0 / float(n_valid)   # number of real pixels (N*H*W)
    inv2 = 1.0 / float(cnt2)      # number of real conv-2 outputs (N*Ho*Wo)

    def kernel(x_ref, w1t_ref, g1_ref, b1_ref, w3r_ref, g3_ref, b3_ref,
               tmask_ref, sel_ref, out_ref, stack_ref):
        # ---- 1x1 bottleneck conv: (Ci, Cin) @ (Cin, L), f32 accumulation ----
        z = jnp.dot(w1t_ref[...], x_ref[...],
                    preferred_element_type=jnp.float32)              # (Ci, L)

        # ---- BN1 (training-mode batch stats over all real pixels) -----------
        vmask = tmask_ref[4:5, :]        # centre tap == pixel-validity mask
        mean1 = jnp.sum(z, axis=1, keepdims=True) * inv1             # pad cols are 0
        d1 = (z - mean1) * vmask
        var1 = jnp.sum(d1 * d1, axis=1, keepdims=True) * inv1        # two-pass var
        scale1 = g1_ref[...] * lax.rsqrt(var1 + BN_EPS)
        shift1 = b1_ref[...] - mean1 * scale1
        a_act = jnp.maximum(z * scale1 + shift1, 0.0)                # (Ci, L) f32

        # ---- 3x3 conv: 9 taps = lane rolls + 0/1 masks, one fused matmul ----
        for k in range(9):
            s = shifts[k]
            rolled = a_act if s == 0 else pltpu.roll(a_act, s, 1)
            stack_ref[k * Ci:(k + 1) * Ci, :] = rolled * tmask_ref[k:k + 1, :]
        acc = jnp.dot(w3r_ref[...], stack_ref[...].astype(compute_dtype),
                      preferred_element_type=jnp.float32)            # (Cout, L)

        # ---- BN2 over the true (possibly strided) conv-output positions -----
        selm = sel_ref[...]
        mean2 = jnp.sum(acc * selm, axis=1, keepdims=True) * inv2
        d2 = (acc - mean2) * selm
        var2 = jnp.sum(d2 * d2, axis=1, keepdims=True) * inv2
        scale2 = g3_ref[...] * lax.rsqrt(var2 + BN_EPS)
        shift2 = b3_ref[...] - mean2 * scale2
        out_ref[...] = jnp.maximum(acc * scale2 + shift2, 0.0)

    return kernel


# -----------------------------------------------------------------------------
# Glue: one fused ConvBN forward via a single pallas_call
# -----------------------------------------------------------------------------
def conv_bn_forward(x_nchw, params, stride, compute_dtype=jnp.bfloat16):
    """x_nchw: (N, Cin, H, W) -> (N, Cout, Ho, Wo)."""
    N, Cin, H, W = x_nchw.shape
    Ci = params['w1'].shape[1]
    Cout = params['w3'].shape[2]
    HW = H * W
    NHW = N * HW
    L = ((NHW + LANE - 1) // LANE) * LANE        # lane-pad pixel axis to x128
    Ho = (H - 1) // stride + 1
    Wo = (W - 1) // stride + 1
    cnt2 = N * Ho * Wo

    # ---- host-side constants: tap boundary masks + stride-selection mask ----
    hh, ww = np.meshgrid(np.arange(H), np.arange(W), indexing='ij')
    tmask = np.zeros((9, L), np.float32)
    for k in range(9):
        dy, dx = k // 3 - 1, k % 3 - 1
        v = ((hh + dy >= 0) & (hh + dy < H) & (ww + dx >= 0) & (ww + dx < W))
        tmask[k, :NHW] = np.tile(v.reshape(-1), N)
    sel = np.zeros((1, L), np.float32)
    sel[0, :NHW] = np.tile(((hh % stride == 0) & (ww % stride == 0)).reshape(-1), N)

    # roll amount per tap so that rolled[:, p] == a[:, p + dy*W + dx]
    jnp_conv = _roll_matches_jnp()
    shifts = []
    for k in range(9):
        dy, dx = k // 3 - 1, k % 3 - 1
        d = dy * W + dx
        shifts.append((-d) % L if jnp_conv else d % L)

    # ---- operands in lane-dense (channels x batch*pixels) layout -------------
    x_flat = jnp.transpose(x_nchw, (1, 0, 2, 3)).reshape(Cin, NHW)
    if L != NHW:
        x_flat = jnp.pad(x_flat, ((0, 0), (0, L - NHW)))
    x_cm = x_flat.astype(compute_dtype)
    w1t = jnp.transpose(params['w1']).astype(compute_dtype)              # (Ci, Cin)
    w3r = jnp.transpose(params['w3'], (2, 0, 1)).reshape(Cout, 9 * Ci)   # tap-major
    w3r = w3r.astype(compute_dtype)
    g1c = params['g1'].reshape(Ci, 1).astype(jnp.float32)
    b1c = params['b1'].reshape(Ci, 1).astype(jnp.float32)
    g3c = params['g3'].reshape(Cout, 1).astype(jnp.float32)
    b3c = params['b3'].reshape(Cout, 1).astype(jnp.float32)
    tmask_j = jnp.asarray(tmask)
    sel_j = jnp.asarray(sel)

    operands = (x_cm, w1t, g1c, b1c, w3r, g3c, b3c, tmask_j, sel_j)
    flops = 2 * Ci * Cin * L + 2 * Cout * 9 * Ci * L
    bytes_accessed = int(sum(int(o.size) * o.dtype.itemsize for o in operands)
                         + Cout * L * 4)

    kernel = _build_convbn_kernel(Ci, NHW, cnt2, shifts, compute_dtype)
    out_flat = pl.pallas_call(
        kernel,
        out_shape=jax.ShapeDtypeStruct((Cout, L), jnp.float32),
        in_specs=[_VMEM_SPEC] * len(operands),
        out_specs=_VMEM_SPEC,
        scratch_shapes=[pltpu.VMEM((9 * Ci, L), jnp.float32)],
        compiler_params=pltpu.CompilerParams(vmem_limit_bytes=32 * 1024 * 1024),
        cost_estimate=pl.CostEstimate(flops=int(flops),
                                      transcendentals=int(2 * (Ci + Cout)),
                                      bytes_accessed=bytes_accessed),
    )(*operands)

    y = out_flat[:, :NHW].reshape(Cout, N, H, W).transpose(1, 0, 2, 3)
    if stride > 1:
        y = y[:, :, ::stride, ::stride]
    return y


# -----------------------------------------------------------------------------
# Pure-JAX f32 reference (for correctness checking only)
# -----------------------------------------------------------------------------
def _bn_train_ref(x, gamma, beta):
    mean = jnp.mean(x, axis=(0, 2, 3), keepdims=True)
    var = jnp.mean((x - mean) ** 2, axis=(0, 2, 3), keepdims=True)
    g = gamma.reshape(1, -1, 1, 1)
    b = beta.reshape(1, -1, 1, 1)
    return (x - mean) * lax.rsqrt(var + BN_EPS) * g + b


def conv_bn_reference(x_nchw, params, stride):
    w1 = params['w1']                                     # (Cin, Ci)
    ci = w1.shape[1]
    cout = params['w3'].shape[2]
    z = lax.conv_general_dilated(
        x_nchw, jnp.transpose(w1)[:, :, None, None], (1, 1), 'VALID',
        dimension_numbers=('NCHW', 'OIHW', 'NCHW'))
    z = jnp.maximum(_bn_train_ref(z, params['g1'], params['b1']), 0.0)
    w3 = jnp.transpose(params['w3'].reshape(3, 3, ci, cout), (3, 2, 0, 1))
    y = lax.conv_general_dilated(
        z, w3, (stride, stride), ((1, 1), (1, 1)),
        dimension_numbers=('NCHW', 'OIHW', 'NCHW'))
    return jnp.maximum(_bn_train_ref(y, params['g3'], params['b3']), 0.0)


# -----------------------------------------------------------------------------
# MSDNLayer: parameter construction + forward
# -----------------------------------------------------------------------------
class Args:
    nScales = 3
    grFactor = [1, 2, 4]
    bnFactor = [1, 2, 4]
    bottleneck = True


def make_convbn_params(key, n_in, n_out, bn_width):
    # bottleneck=True => nInner = min(nIn, bnWidth * nOut)
    n_inner = min(n_in, bn_width * n_out)
    k1, k2, k3, k4, k5, k6 = jax.random.split(key, 6)
    w1 = jax.random.normal(k1, (n_in, n_inner), jnp.float32) / math.sqrt(n_in)
    w3 = jax.random.normal(k2, (9, n_inner, n_out), jnp.float32) / math.sqrt(9 * n_inner)
    g1 = 0.5 + jax.random.uniform(k3, (1, n_inner), jnp.float32)
    b1 = 0.1 * jax.random.normal(k4, (1, n_inner), jnp.float32)
    g3 = 0.5 + jax.random.uniform(k5, (1, n_out), jnp.float32)
    b3 = 0.1 * jax.random.normal(k6, (1, n_out), jnp.float32)
    return dict(w1=w1, w3=w3, g1=g1, b1=b1, g3=g3, b3=b3)


def make_msdn_layer_params(key, n_in, n_out, args, in_scales=None, out_scales=None):
    in_scales = in_scales if in_scales is not None else args.nScales
    out_scales = out_scales if out_scales is not None else args.nScales
    n_scales = args.nScales
    discard = in_scales - out_scales
    offset = n_scales - out_scales
    layers = []
    keys = jax.random.split(key, out_scales)
    if discard > 0:
        _n_out = n_out * args.grFactor[offset]
        layers.append(dict(
            kind='down_normal',
            down=make_convbn_params(jax.random.fold_in(keys[0], 0),
                                    n_in * args.grFactor[offset - 1], _n_out // 2,
                                    args.bnFactor[offset - 1]),
            normal=make_convbn_params(jax.random.fold_in(keys[0], 1),
                                      n_in * args.grFactor[offset], _n_out // 2,
                                      args.bnFactor[offset])))
    else:
        layers.append(dict(
            kind='normal',
            normal=make_convbn_params(keys[0], n_in * args.grFactor[offset],
                                      n_out * args.grFactor[offset],
                                      args.bnFactor[offset])))
    for idx, i in enumerate(range(offset + 1, n_scales)):
        k = keys[idx + 1]
        _n_out = n_out * args.grFactor[i]
        layers.append(dict(
            kind='down_normal',
            down=make_convbn_params(jax.random.fold_in(k, 0),
                                    n_in * args.grFactor[i - 1], _n_out // 2,
                                    args.bnFactor[i - 1]),
            normal=make_convbn_params(jax.random.fold_in(k, 1),
                                      n_in * args.grFactor[i], _n_out // 2,
                                      args.bnFactor[i])))
    meta = dict(discard=discard, offset=offset, out_scales=out_scales)
    return layers, meta


def msdn_layer_forward(x_list, layers, meta, use_kernel=True,
                       compute_dtype=jnp.bfloat16):
    if use_kernel:
        conv = lambda x, p, s: conv_bn_forward(x, p, s, compute_dtype=compute_dtype)
    else:
        conv = conv_bn_reference
    discard, out_scales = meta['discard'], meta['out_scales']
    if discard > 0:
        inp = [[x_list[i - 1], x_list[i]] for i in range(1, out_scales + 1)]
    else:
        inp = [[x_list[0]]] + [[x_list[i - 1], x_list[i]]
                               for i in range(1, out_scales)]
    res = []
    for i in range(out_scales):
        layer, xi = layers[i], inp[i]
        if layer['kind'] == 'normal':
            y = conv(xi[0], layer['normal'], 1)
            res.append(jnp.concatenate([xi[0], y], axis=1))          # torch.cat dim=1
        else:
            y_down = conv(xi[0], layer['down'], 2)
            y_norm = conv(xi[1], layer['normal'], 1)
            res.append(jnp.concatenate([xi[1], y_down, y_norm], axis=1))
    return res


# -----------------------------------------------------------------------------
# Main
# -----------------------------------------------------------------------------
if __name__ == "__main__":
    args = Args()
    n_in, n_out = 4, 4
    N, H0 = 2, 16

    key = jax.random.PRNGKey(0)
    k_x, k_p = jax.random.split(key)

    # Multi-scale inputs: scale s has nIn*grFactor[s] channels, H0/2**s spatial.
    xs = []
    for s in range(args.nScales):
        c = n_in * args.grFactor[s]
        hw = H0 // (2 ** s)
        xs.append(jax.random.normal(jax.random.fold_in(k_x, s),
                                    (N, c, hw, hw), jnp.float32))

    layers, meta = make_msdn_layer_params(k_p, n_in, n_out, args)

    # Pure-JAX f32 reference.
    ref = msdn_layer_forward(xs, layers, meta, use_kernel=False)
    ref = jax.block_until_ready(ref)

    # Fast path: bf16 MXU inputs, f32 accumulation / BN statistics.  Loose
    # tolerance only because the reference keeps its matmul inputs in f32;
    # structural errors would be O(1) and still fail this check.
    out_bf16 = msdn_layer_forward(xs, layers, meta, use_kernel=True,
                                  compute_dtype=jnp.bfloat16)
    out_bf16 = jax.block_until_ready(out_bf16)
    for o, r in zip(out_bf16, ref):
        np.testing.assert_allclose(np.asarray(o), np.asarray(r),
                                   rtol=1e-1, atol=1e-1)

    # f32 compute path: tight check of the kernel semantics.
    out_f32 = msdn_layer_forward(xs, layers, meta, use_kernel=True,
                                 compute_dtype=jnp.float32)
    out_f32 = jax.block_until_ready(out_f32)
    for o, r in zip(out_f32, ref):
        np.testing.assert_allclose(np.asarray(o), np.asarray(r),
                                   rtol=5e-3, atol=5e-3)

    print("KERNEL_OK")
</pallas_src>

<mosaic_0001>
module attributes {stable_mosaic.version = 11 : i64} {
  func.func @probe(%arg0: memref<1x128xf32, #tpu.memory_space<vmem>>, %arg1: memref<1x128xf32, #tpu.memory_space<vmem>>) attributes {dimension_semantics = [], scalar_prefetch = 0 : i64, scratch_operands = 0 : i64, tpu.core_type = #tpu.core_type<tc>} {
    %c0 = arith.constant 0 : index
    %c0_0 = arith.constant 0 : index
    %0 = vector.load %arg0[%c0, %c0_0] : memref<1x128xf32, #tpu.memory_space<vmem>>, vector<1x128xf32>
    %c1_i32 = arith.constant 1 : i32
    %1 = tpu.dynamic_rotate %0 by %c1_i32 dim 1 : vector<1x128xf32>, i32 -> vector<1x128xf32>
    %c0_1 = arith.constant 0 : index
    %c0_2 = arith.constant 0 : index
    %2 = vector.load %arg1[%c0_1, %c0_2] : memref<1x128xf32, #tpu.memory_space<vmem>>, vector<1x128xf32>
    tpu.vector_store %arg1[%c0_1, %c0_2], %1 {strides = array<i32>} : memref<1x128xf32, #tpu.memory_space<vmem>>, vector<1x128xf32>,
    return
  }
}

</mosaic_0001>

<bundles_post_ra>
// kernel: tpu_custom_call.1
= control target key start
LH: loop header
LB: loop body
LE: loop exit
PB: predicated region body
PF: predicated region fallthrough
CT: control target
= control target key end

     0   :  { %6 = vsyncpa [#allocation3], 0  ;;  %s128_s0 = inlined_call_operand.hbm [shape: f32[1,128], index: 0, kind: input, shape index: {}]   ;;  %s129_s1 = inlined_call_operand.hbm [shape: f32[1,128], index: 1, kind: output, shape index: {}]  }
   0x1   :  { %7 = vsyncpa [#allocation4], 0  ;;  %s91_s6 = smov [#allocation2]   ;;  %s43_s10 = scalar_lea.hbm %s128_s0, 16 }
   0x2   :  { %s14_s7 = sshll.u32 %s91_s6, 4  ;;  %p44_p0 = scmp.ne.s32.totalorder %s128_s0, %s43_s10  ;;  %s15_s7 = int_to_ptr.vmem [resolvable:$true] %s14_s7 }
   0x3   :  { %p47_p1 = scmp.lt.u32.totalorder %s43_s10, %s128_s0 }
   0x5   :  { %p49_p2 = pnand %p47_p1, %p44_p0 }
   0x7   :  { %52 = shalt.err (!%p49_p2)
}
   0x8   :  { %s53_s15 = scalar_lea.vmem %s15_s7, 16  ;;  %s57_s16 = scalar_lea.vmem %s15_s7, 32 }
   0x9   :  { %p54_p3 = scmp.ne.s32.totalorder %s15_s7, %s53_s15  ;;  %p58_p4 = scmp.lt.s32.totalorder %s15_s7, %s15_s7 }
   0xa   :  { %p59_p5 = scmp.lt.s32.totalorder %s57_s16, %s53_s15 }
   0xc   :  { %p60_p6 = por %p59_p5, %p58_p4 }
   0xe   :  { %p61_p7 = pnand %p60_p6, %p54_p3 }
  0x10   :  { %64 = shalt.err (!%p61_p7)
}
  0x11   :  { %17 = dma.hbm_to_vmem [thread:$0]  %s128_s0, 16, %s15_s7, [#allocation3]  }
  0x12   :  { %87 = dma.done.wait [#allocation3], 16  }
  0x13   :  { %88 = vsyncadd [#allocation3], 4294967280  ;;  %v21_v0 = vld [vmem:[#allocation2] sm:$0x1]  ;;  %s92_s19 = smov 1   ;;  %s93_s20 = smov [#allocation5]  }
  0x14   :  { %22 = vrot.lane.b32.xlu0 %v21_v0, %s92_s19  ;;  %s31_s21 = sshll.u32 %s93_s20, 4  ;;  %s32_s21 = int_to_ptr.vmem [resolvable:$true] %s31_s21 }
  0x15   :  { %s65_s22 = scalar_lea.vmem %s32_s21, 16  ;;  %s69_s23 = scalar_lea.vmem %s32_s21, 32 }
  0x16   :  { %p66_p8 = scmp.ne.s32.totalorder %s32_s21, %s65_s22  ;;  %p70_p9 = scmp.lt.s32.totalorder %s32_s21, %s32_s21 }
  0x17   :  { %p71_p10 = scmp.lt.s32.totalorder %s69_s23, %s65_s22 }
  0x19   :  { %p72_p11 = por %p71_p10, %p70_p9 }
  0x1b   :  { %p73_p12 = pnand %p72_p11, %p66_p8 }
  0x86   :  { %v23_v1 = vpop.permute.xlu0 %22 }
  0x87   :  { %24 = vst [vmem:[#allocation5] sm:$0x1] %v23_v1 }
  0x88   :  { %76 = shalt.err (!%p73_p12)
}
  0x89   :  { %s77_s25 = scalar_lea.hbm %s129_s1, 16 }
  0x8a   :  { %p78_p13 = scmp.ne.s32.totalorder %s129_s1, %s77_s25  ;;  %p81_p0 = scmp.lt.u32.totalorder %s77_s25, %s129_s1 }
  0x8c   :  { %p83_p1 = pnand %p81_p0, %p78_p13 }
  0x8e   :  { %86 = shalt.err (!%p83_p1)
}
  0x8f   :  { %34 = dma.vmem_to_hbm [thread:$0]  %s32_s21, 16, %s129_s1, [#allocation4]  }
  0x90   :  { %89 = dma.done.wait [#allocation4], 16  }
  0x91   :  { %90 = vsyncadd [#allocation4], 4294967280 }
  0x92   :  { %38 = vsyncpa [#allocation3], 1 }
  0x93   :  { %39 = vsyncpa [#allocation4], 1 }

</bundles_post_ra>
